<compile_context>
chip_gen: v7x
topology: tpu7x:2x2x1
jax: 0.10.0
libtpu: 0.0.40
codegen_flags: <defaults>
</compile_context>

<pallas_src>
import jax
import jax.numpy as jnp
from jax import lax
from jax.experimental import pallas as pl
from jax.experimental.pallas import tpu as pltpu

EPS = 1e-5          # PyTorch default eps for LayerNorm and BatchNorm1d
LANE = 128

# Row indices inside the packed per-block vector parameter array (NB, 8, Dp).
VEC_LN_W, VEC_LN_B, VEC_B1, VEC_BN1_W, VEC_BN1_B, VEC_B2, VEC_BN2_W, VEC_BN2_B = range(8)


def _round_up(n, m):
    return ((n + m - 1) // m) * m


def _derive_vmem_limit(B, Dp, Op):
    w_stream = 2 * (2 * Dp * Dp * 2)          # w1 + w2 blocks, double-buffered, bf16
    vec_stream = 2 * (8 * Dp * 4)             # packed per-block vectors, double-buffered
    resident = B * Dp * 4 + Dp * Op * 2 + Op * 4 + B * Op * 4
    need = int((w_stream + vec_stream + resident) * 1.25) + (2 << 20)
    # Cap below v7x's 64 MiB physical VMEM; at large D prefer feature-dim tiling.
    return max(4 << 20, min(need, 56 << 20))


def _make_kernel(true_d, d_pad):
    """Kernel closure capturing the true (unpadded) feature dim."""

    def _resnet_kernel(x_hbm, vec_ref, w1_ref, w2_ref, fw_hbm, fb_hbm,   # inputs
                       out_ref,                                          # output
                       h_ref, fw_vmem, fb_vmem, sems):                   # scratch
        i = pl.program_id(0)
        nb = pl.num_programs(0)

        # ---- first block: seed persistent activation, prefetch final-linear params
        @pl.when(i == 0)
        def _():
            cp_x = pltpu.make_async_copy(x_hbm, h_ref, sems.at[0])
            cp_x.start()
            # Final-linear params are only needed at i == nb-1; start now, wait later.
            pltpu.make_async_copy(fw_hbm, fw_vmem, sems.at[1]).start()
            pltpu.make_async_copy(fb_hbm, fb_vmem, sems.at[2]).start()
            cp_x.wait()

        h = h_ref[...]                 # (B, Dp) fp32 persistent activation (padded lanes == 0)
        vec = vec_ref[0]               # (8, Dp) fp32 packed per-block vector params
        inv_d = jnp.float32(1.0 / true_d)

        # Lane mask over the real (unpadded) features.
        lane_ids = lax.broadcasted_iota(jnp.int32, (1, d_pad), 1)
        feat_mask = (lane_ids < true_d).astype(jnp.float32)

        # ---- LayerNorm over the true feature dim (two-pass variance) ----
        mu = jnp.sum(h, axis=-1, keepdims=True) * inv_d          # padded lanes are 0
        hc = (h - mu) * feat_mask
        var = jnp.sum(hc * hc, axis=-1, keepdims=True) * inv_d
        xn = hc * lax.rsqrt(var + EPS)
        xn = xn * vec[VEC_LN_W:VEC_LN_W + 1] + vec[VEC_LN_B:VEC_LN_B + 1]
        residual = xn                                            # residual = LN(x), per module

        # ---- fc1 (bf16 MXU, fp32 accumulate) ----
        out = jnp.dot(xn.astype(jnp.bfloat16), w1_ref[0],
                      preferred_element_type=jnp.float32) + vec[VEC_B1:VEC_B1 + 1]

        # ---- BatchNorm1d #1 (training mode: batch stats, biased variance, two-pass) ----
        bm = jnp.mean(out, axis=0, keepdims=True)
        oc = out - bm
        bv = jnp.mean(oc * oc, axis=0, keepdims=True)
        out = oc * lax.rsqrt(bv + EPS)
        out = out * vec[VEC_BN1_W:VEC_BN1_W + 1] + vec[VEC_BN1_B:VEC_BN1_B + 1]
        out = jnp.maximum(out, 0.0)

        # ---- fc2 (bf16 MXU, fp32 accumulate) ----
        out = jnp.dot(out.astype(jnp.bfloat16), w2_ref[0],
                      preferred_element_type=jnp.float32) + vec[VEC_B2:VEC_B2 + 1]

        # ---- BatchNorm1d #2 (weight initialized to 0 per the module) ----
        bm2 = jnp.mean(out, axis=0, keepdims=True)
        oc2 = out - bm2
        bv2 = jnp.mean(oc2 * oc2, axis=0, keepdims=True)
        out = oc2 * lax.rsqrt(bv2 + EPS)
        out = out * vec[VEC_BN2_W:VEC_BN2_W + 1] + vec[VEC_BN2_B:VEC_BN2_B + 1]

        # ---- residual add + ReLU (padded lanes remain exactly 0) ----
        out = jnp.maximum(out + residual, 0.0)
        h_ref[...] = out

        # ---- final Linear on the last block iteration (bf16 weights, f32 acc) ----
        @pl.when(i == nb - 1)
        def _():
            pltpu.make_async_copy(fw_hbm, fw_vmem, sems.at[1]).wait()
            pltpu.make_async_copy(fb_hbm, fb_vmem, sems.at[2]).wait()
            y = jnp.dot(out.astype(jnp.bfloat16), fw_vmem[...],
                        preferred_element_type=jnp.float32) + fb_vmem[...]
            out_ref[...] = y.astype(out_ref.dtype)

    return _resnet_kernel


def resnet_forward(x, params):
    B = x.shape[0]
    D, O = params["input_dim"], params["output_dim"]
    Dp, Op = params["d_pad"], params["o_pad"]
    NB = params["w1_t"].shape[0]

    # Lane-dense (pad feature dim to a multiple of 128); padded lanes are zero.
    x_p = jnp.zeros((B, Dp), jnp.float32).at[:, :D].set(x.astype(jnp.float32))

    grid_spec = pltpu.PrefetchScalarGridSpec(
        num_scalar_prefetch=0,
        grid=(NB,),
        in_specs=[
            pl.BlockSpec(memory_space=pl.ANY),                # x: HBM, copied once at i==0
            pl.BlockSpec((1, 8, Dp), lambda i: (i, 0, 0)),    # packed per-block vectors
            pl.BlockSpec((1, Dp, Dp), lambda i: (i, 0, 0)),   # w1_t (bf16)
            pl.BlockSpec((1, Dp, Dp), lambda i: (i, 0, 0)),   # w2_t (bf16)
            pl.BlockSpec(memory_space=pl.ANY),                # final_w_t: HBM, manual DMA
            pl.BlockSpec(memory_space=pl.ANY),                # final_b:   HBM, manual DMA
        ],
        out_specs=pl.BlockSpec((B, Op), lambda i: (0, 0)),
        scratch_shapes=[
            pltpu.VMEM((B, Dp), jnp.float32),                 # persistent activation
            pltpu.VMEM((Dp, Op), jnp.bfloat16),               # final weight landing buffer
            pltpu.VMEM((1, Op), jnp.float32),                 # final bias landing buffer
            pltpu.SemaphoreType.DMA((3,)),                    # x / fw / fb copy sems
        ],
    )

    y_pad = pl.pallas_call(
        _make_kernel(D, Dp),
        out_shape=jax.ShapeDtypeStruct((B, Op), jnp.float32),
        grid_spec=grid_spec,
        compiler_params=pltpu.CompilerParams(
            dimension_semantics=("arbitrary",),               # serial carry via h scratch
            vmem_limit_bytes=_derive_vmem_limit(B, Dp, Op),
        ),
    )(x_p, params["vecs"], params["w1_t"], params["w2_t"],
      params["final_w_t"], params["final_b"])

    return y_pad[:, :O]


def init_raw_params(key, input_dim, output_dim, num_blocks):
    """Deterministic synthetic params in the PyTorch module's shapes/layout."""
    D, O, NB = input_dim, output_dim, num_blocks
    ks = jax.random.split(key, 6)
    bound = 1.0 / (D ** 0.5)
    u = lambda k, shape: jax.random.uniform(k, shape, jnp.float32, -bound, bound)
    return dict(
        ln_w=jnp.ones((NB, D), jnp.float32),            # LayerNorm weight = 1
        ln_b=jnp.zeros((NB, D), jnp.float32),           # LayerNorm bias   = 0
        w1=u(ks[0], (NB, D, D)),                        # PyTorch layout (out, in)
        b1=u(ks[1], (NB, D)),
        bn1_w=jnp.ones((NB, D), jnp.float32),
        bn1_b=jnp.zeros((NB, D), jnp.float32),
        w2=u(ks[2], (NB, D, D)),
        b2=u(ks[3], (NB, D)),
        bn2_w=jnp.zeros((NB, D), jnp.float32),          # nn.init.constant_(bn2.weight, 0)
        bn2_b=jnp.zeros((NB, D), jnp.float32),
        final_w=u(ks[4], (O, D)),
        final_b=u(ks[5], (O,)),
        input_dim=D, output_dim=O,
    )


def prepare_params(raw):
    """Pack / transpose / zero-pad params into the kernel's streaming layout."""
    D, O = raw["input_dim"], raw["output_dim"]
    NB = raw["w1"].shape[0]
    Dp, Op = _round_up(D, LANE), _round_up(O, LANE)

    def pad_vec(v):                                      # (NB, D) -> (NB, Dp)
        return jnp.zeros((NB, Dp), jnp.float32).at[:, :D].set(v)

    # Packed (NB, 8, Dp): one DMA per block for all vector params.
    vecs = jnp.stack([pad_vec(raw["ln_w"]), pad_vec(raw["ln_b"]),
                      pad_vec(raw["b1"]), pad_vec(raw["bn1_w"]), pad_vec(raw["bn1_b"]),
                      pad_vec(raw["b2"]), pad_vec(raw["bn2_w"]), pad_vec(raw["bn2_b"])],
                     axis=1)

    def pad_w(w):                                        # (NB, out, in) -> (NB, Dp_in, Dp_out) bf16
        wt = jnp.transpose(w, (0, 2, 1))
        return (jnp.zeros((NB, Dp, Dp), jnp.float32)
                .at[:, :D, :D].set(wt)).astype(jnp.bfloat16)

    final_w_t = (jnp.zeros((Dp, Op), jnp.float32)
                 .at[:D, :O].set(raw["final_w"].T)).astype(jnp.bfloat16)
    final_b = jnp.zeros((1, Op), jnp.float32).at[0, :O].set(raw["final_b"])

    return dict(vecs=vecs, w1_t=pad_w(raw["w1"]), w2_t=pad_w(raw["w2"]),
                final_w_t=final_w_t, final_b=final_b,
                input_dim=D, output_dim=O, d_pad=Dp, o_pad=Op)


def resnet_reference(x, raw):
    """Pure-JAX reference mirroring the PyTorch forward (training-mode BN),
    with the same bf16 weight/activation rounding as the kernel's MXU path."""
    hp = lax.Precision.HIGHEST
    bf = lambda a: a.astype(jnp.bfloat16).astype(jnp.float32)
    NB = raw["w1"].shape[0]
    h = x.astype(jnp.float32)
    for i in range(NB):
        mu = h.mean(-1, keepdims=True)
        var = ((h - mu) ** 2).mean(-1, keepdims=True)
        xn = (h - mu) / jnp.sqrt(var + EPS) * raw["ln_w"][i] + raw["ln_b"][i]
        res = xn
        o = jnp.dot(bf(xn), bf(raw["w1"][i].T), precision=hp) + raw["b1"][i]
        bm = o.mean(0); bv = ((o - bm) ** 2).mean(0)
        o = (o - bm) / jnp.sqrt(bv + EPS) * raw["bn1_w"][i] + raw["bn1_b"][i]
        o = jnp.maximum(o, 0.0)
        o = jnp.dot(bf(o), bf(raw["w2"][i].T), precision=hp) + raw["b2"][i]
        bm = o.mean(0); bv = ((o - bm) ** 2).mean(0)
        o = (o - bm) / jnp.sqrt(bv + EPS) * raw["bn2_w"][i] + raw["bn2_b"][i]
        h = jnp.maximum(o + res, 0.0)
    return jnp.dot(bf(h), bf(raw["final_w"].T), precision=hp) + raw["final_b"]


if __name__ == "__main__":
    batch, input_dim, output_dim, num_blocks = 8, 32, 16, 2

    key = jax.random.PRNGKey(0)
    kx, kp = jax.random.split(key)
    x = jax.random.normal(kx, (batch, input_dim), jnp.float32)
    raw = init_raw_params(kp, input_dim, output_dim, num_blocks)
    params = prepare_params(raw)

    y = jax.block_until_ready(resnet_forward(x, params))
    y_ref = resnet_reference(x, raw)

    assert y.shape == (batch, output_dim)
    assert jnp.allclose(y, y_ref, rtol=1e-2, atol=1e-2), "Pallas output mismatch vs reference"

    print("KERNEL_OK")
</pallas_src>

<mosaic_0001>
module attributes {stable_mosaic.version = 11 : i64} {
  func.func @_resnet_kernel(%arg0: i32, %arg1: memref<8x128xf32, #tpu.memory_space<any>>, %arg2: memref<1x8x128xf32, #tpu.memory_space<vmem>>, %arg3: memref<1x128x128xbf16, #tpu.memory_space<vmem>>, %arg4: memref<1x128x128xbf16, #tpu.memory_space<vmem>>, %arg5: memref<128x128xbf16, #tpu.memory_space<any>>, %arg6: memref<1x128xf32, #tpu.memory_space<any>>, %arg7: memref<8x128xf32, #tpu.memory_space<vmem>>, %arg8: memref<8x128xf32, #tpu.memory_space<vmem>>, %arg9: memref<128x128xbf16, #tpu.memory_space<vmem>>, %arg10: memref<1x128xf32, #tpu.memory_space<vmem>>, %arg11: memref<3x!tpu.dma_semaphore, #tpu.memory_space<semaphore_mem>>) attributes {dimension_semantics = [#tpu.dimension_semantics<arbitrary>], iteration_bounds = array<i64: 2>, scalar_prefetch = 0 : i64, scratch_operands = 4 : i64, tpu.core_type = #tpu.core_type<tc>, window_params = [{}, {transform_indices = @transform_1, window_bounds = array<i64: 1, 8, 128>}, {transform_indices = @transform_2, window_bounds = array<i64: 1, 128, 128>}, {transform_indices = @transform_3, window_bounds = array<i64: 1, 128, 128>}, {}, {}, {pipeline_mode = #tpu.pipeline_mode<synchronous>, transform_indices = @transform_6, window_bounds = array<i64: 8, 128>}]} {
    %c0_i32 = arith.constant 0 : i32
    %0 = arith.cmpi eq, %arg0, %c0_i32 : i32
    %1 = arith.extui %0 : i1 to i32
    %c0_i32_0 = arith.constant 0 : i32
    %2 = arith.cmpi ne, %1, %c0_i32_0 : i32
    scf.if %2 {
      %c0_i32_32 = arith.constant 0 : i32
      %102 = tpu.memref_slice %arg11[%c0_i32_32] : memref<3x!tpu.dma_semaphore, #tpu.memory_space<semaphore_mem>> -> memref<1x!tpu.dma_semaphore, #tpu.memory_space<semaphore_mem>>
      %103 = tpu.memref_squeeze %102 : memref<1x!tpu.dma_semaphore, #tpu.memory_space<semaphore_mem>> -> memref<!tpu.dma_semaphore, #tpu.memory_space<semaphore_mem>>
      tpu.enqueue_dma source(%arg1 : memref<8x128xf32, #tpu.memory_space<any>>) target(%arg8 : memref<8x128xf32, #tpu.memory_space<vmem>>) target_semaphore(%103 : memref<!tpu.dma_semaphore, #tpu.memory_space<semaphore_mem>>)
      %c1_i32_33 = arith.constant 1 : i32
      %104 = tpu.memref_slice %arg11[%c1_i32_33] : memref<3x!tpu.dma_semaphore, #tpu.memory_space<semaphore_mem>> -> memref<1x!tpu.dma_semaphore, #tpu.memory_space<semaphore_mem>>
      %105 = tpu.memref_squeeze %104 : memref<1x!tpu.dma_semaphore, #tpu.memory_space<semaphore_mem>> -> memref<!tpu.dma_semaphore, #tpu.memory_space<semaphore_mem>>
      tpu.enqueue_dma source(%arg5 : memref<128x128xbf16, #tpu.memory_space<any>>) target(%arg9 : memref<128x128xbf16, #tpu.memory_space<vmem>>) target_semaphore(%105 : memref<!tpu.dma_semaphore, #tpu.memory_space<semaphore_mem>>)
      %c2_i32 = arith.constant 2 : i32
      %106 = tpu.memref_slice %arg11[%c2_i32] : memref<3x!tpu.dma_semaphore, #tpu.memory_space<semaphore_mem>> -> memref<1x!tpu.dma_semaphore, #tpu.memory_space<semaphore_mem>>
      %107 = tpu.memref_squeeze %106 : memref<1x!tpu.dma_semaphore, #tpu.memory_space<semaphore_mem>> -> memref<!tpu.dma_semaphore, #tpu.memory_space<semaphore_mem>>
      tpu.enqueue_dma source(%arg6 : memref<1x128xf32, #tpu.memory_space<any>>) target(%arg10 : memref<1x128xf32, #tpu.memory_space<vmem>>) target_semaphore(%107 : memref<!tpu.dma_semaphore, #tpu.memory_space<semaphore_mem>>)
      %c0_i32_34 = arith.constant 0 : i32
      %108 = tpu.memref_slice %arg11[%c0_i32_34] : memref<3x!tpu.dma_semaphore, #tpu.memory_space<semaphore_mem>> -> memref<1x!tpu.dma_semaphore, #tpu.memory_space<semaphore_mem>>
      %109 = tpu.memref_squeeze %108 : memref<1x!tpu.dma_semaphore, #tpu.memory_space<semaphore_mem>> -> memref<!tpu.dma_semaphore, #tpu.memory_space<semaphore_mem>>
      tpu.wait_dma2 semaphore(%109 : memref<!tpu.dma_semaphore, #tpu.memory_space<semaphore_mem>>) src(%arg1 : memref<8x128xf32, #tpu.memory_space<any>>) dst(%arg8 : memref<8x128xf32, #tpu.memory_space<vmem>>)
    } else {
    }
    %c0 = arith.constant 0 : index
    %c0_1 = arith.constant 0 : index
    %3 = vector.load %arg8[%c0, %c0_1] : memref<8x128xf32, #tpu.memory_space<vmem>>, vector<8x128xf32>
    %c0_2 = arith.constant 0 : index
    %c0_3 = arith.constant 0 : index
    %c0_4 = arith.constant 0 : index
    %4 = vector.load %arg2[%c0_2, %c0_3, %c0_4] : memref<1x8x128xf32, #tpu.memory_space<vmem>>, vector<1x8x128xf32>
    %5 = vector.shape_cast %4 : vector<1x8x128xf32> to vector<8x128xf32>
    %6 = tpu.iota {dimensions = array<i32: 1>} : vector<1x128xi32>
    %c32_i32 = arith.constant 32 : i32
    %7 = vector.broadcast %c32_i32 : i32 to vector<1x128xi32>
    %8 = arith.cmpi slt, %6, %7 : vector<1x128xi32>
    %9 = arith.extui %8 : vector<1x128xi1> to vector<1x128xi32>
    %10 = arith.sitofp %9 : vector<1x128xi32> to vector<1x128xf32>
    %cst = arith.constant dense<0.000000e+00> : vector<8xf32>
    %11 = vector.multi_reduction <add>, %3, %cst [1] : vector<8x128xf32> to vector<8xf32>
    %12 = vector.shape_cast %11 : vector<8xf32> to vector<8x1xf32>
    %cst_5 = arith.constant 3.125000e-02 : f32
    %13 = vector.broadcast %cst_5 : f32 to vector<8x1xf32>
    %14 = arith.mulf %12, %13 : vector<8x1xf32>
    %15 = vector.broadcast %14 : vector<8x1xf32> to vector<8x128xf32>
    %16 = arith.subf %3, %15 : vector<8x128xf32>
    %17 = vector.broadcast %10 : vector<1x128xf32> to vector<8x128xf32>
    %18 = arith.mulf %16, %17 : vector<8x128xf32>
    %19 = arith.mulf %18, %18 : vector<8x128xf32>
    %cst_6 = arith.constant dense<0.000000e+00> : vector<8xf32>
    %20 = vector.multi_reduction <add>, %19, %cst_6 [1] : vector<8x128xf32> to vector<8xf32>
    %21 = vector.shape_cast %20 : vector<8xf32> to vector<8x1xf32>
    %cst_7 = arith.constant 3.125000e-02 : f32
    %22 = vector.broadcast %cst_7 : f32 to vector<8x1xf32>
    %23 = arith.mulf %21, %22 : vector<8x1xf32>
    %cst_8 = arith.constant 9.99999974E-6 : f32
    %24 = vector.broadcast %cst_8 : f32 to vector<8x1xf32>
    %25 = arith.addf %23, %24 : vector<8x1xf32>
    %26 = math.rsqrt %25 : vector<8x1xf32>
    %27 = vector.broadcast %26 : vector<8x1xf32> to vector<8x128xf32>
    %28 = arith.mulf %18, %27 : vector<8x128xf32>
    %29 = vector.extract_strided_slice %5 {offsets = [0, 0], sizes = [1, 128], strides = [1, 1]} : vector<8x128xf32> to vector<1x128xf32>
    %30 = vector.broadcast %29 : vector<1x128xf32> to vector<8x128xf32>
    %31 = arith.mulf %28, %30 : vector<8x128xf32>
    %32 = vector.extract_strided_slice %5 {offsets = [1, 0], sizes = [1, 128], strides = [1, 1]} : vector<8x128xf32> to vector<1x128xf32>
    %33 = vector.broadcast %32 : vector<1x128xf32> to vector<8x128xf32>
    %34 = arith.addf %31, %33 : vector<8x128xf32>
    %35 = arith.truncf %34 : vector<8x128xf32> to vector<8x128xbf16>
    %c0_9 = arith.constant 0 : index
    %c0_10 = arith.constant 0 : index
    %c0_11 = arith.constant 0 : index
    %36 = vector.load %arg3[%c0_9, %c0_10, %c0_11] : memref<1x128x128xbf16, #tpu.memory_space<vmem>>, vector<1x128x128xbf16>
    %37 = vector.shape_cast %36 : vector<1x128x128xbf16> to vector<128x128xbf16>
    %cst_12 = arith.constant dense<0.000000e+00> : vector<8x128xf32>
    %38 = tpu.matmul %35, %37, %cst_12 {dimension_numbers = #tpu.dot_dimension_numbers<[1], [0], [0], [1], [0, 0, 1, 1], [], []>} : vector<8x128xbf16>, vector<128x128xbf16>, vector<8x128xf32> -> vector<8x128xf32>
    %39 = vector.extract_strided_slice %5 {offsets = [2, 0], sizes = [1, 128], strides = [1, 1]} : vector<8x128xf32> to vector<1x128xf32>
    %40 = vector.broadcast %39 : vector<1x128xf32> to vector<8x128xf32>
    %41 = arith.addf %38, %40 : vector<8x128xf32>
    %cst_13 = arith.constant dense<0.000000e+00> : vector<128xf32>
    %42 = vector.multi_reduction <add>, %41, %cst_13 [0] : vector<8x128xf32> to vector<128xf32>
    %43 = vector.shape_cast %42 : vector<128xf32> to vector<1x128xf32>
    %cst_14 = arith.constant 8.000000e+00 : f32
    %44 = vector.broadcast %cst_14 : f32 to vector<1x128xf32>
    %45 = arith.divf %43, %44 : vector<1x128xf32>
    %46 = vector.broadcast %45 : vector<1x128xf32> to vector<8x128xf32>
    %47 = arith.subf %41, %46 : vector<8x128xf32>
    %48 = arith.mulf %47, %47 : vector<8x128xf32>
    %cst_15 = arith.constant dense<0.000000e+00> : vector<128xf32>
    %49 = vector.multi_reduction <add>, %48, %cst_15 [0] : vector<8x128xf32> to vector<128xf32>
    %50 = vector.shape_cast %49 : vector<128xf32> to vector<1x128xf32>
    %cst_16 = arith.constant 8.000000e+00 : f32
    %51 = vector.broadcast %cst_16 : f32 to vector<1x128xf32>
    %52 = arith.divf %50, %51 : vector<1x128xf32>
    %cst_17 = arith.constant 9.99999974E-6 : f32
    %53 = vector.broadcast %cst_17 : f32 to vector<1x128xf32>
    %54 = arith.addf %52, %53 : vector<1x128xf32>
    %55 = math.rsqrt %54 : vector<1x128xf32>
    %56 = vector.broadcast %55 : vector<1x128xf32> to vector<8x128xf32>
    %57 = arith.mulf %47, %56 : vector<8x128xf32>
    %58 = vector.extract_strided_slice %5 {offsets = [3, 0], sizes = [1, 128], strides = [1, 1]} : vector<8x128xf32> to vector<1x128xf32>
    %59 = vector.broadcast %58 : vector<1x128xf32> to vector<8x128xf32>
    %60 = arith.mulf %57, %59 : vector<8x128xf32>
    %61 = vector.extract_strided_slice %5 {offsets = [4, 0], sizes = [1, 128], strides = [1, 1]} : vector<8x128xf32> to vector<1x128xf32>
    %62 = vector.broadcast %61 : vector<1x128xf32> to vector<8x128xf32>
    %63 = arith.addf %60, %62 : vector<8x128xf32>
    %cst_18 = arith.constant 0.000000e+00 : f32
    %64 = vector.broadcast %cst_18 : f32 to vector<8x128xf32>
    %65 = arith.maximumf %63, %64 : vector<8x128xf32>
    %66 = arith.truncf %65 : vector<8x128xf32> to vector<8x128xbf16>
    %c0_19 = arith.constant 0 : index
    %c0_20 = arith.constant 0 : index
    %c0_21 = arith.constant 0 : index
    %67 = vector.load %arg4[%c0_19, %c0_20, %c0_21] : memref<1x128x128xbf16, #tpu.memory_space<vmem>>, vector<1x128x128xbf16>
    %68 = vector.shape_cast %67 : vector<1x128x128xbf16> to vector<128x128xbf16>
    %cst_22 = arith.constant dense<0.000000e+00> : vector<8x128xf32>
    %69 = tpu.matmul %66, %68, %cst_22 {dimension_numbers = #tpu.dot_dimension_numbers<[1], [0], [0], [1], [0, 0, 1, 1], [], []>} : vector<8x128xbf16>, vector<128x128xbf16>, vector<8x128xf32> -> vector<8x128xf32>
    %70 = vector.extract_strided_slice %5 {offsets = [5, 0], sizes = [1, 128], strides = [1, 1]} : vector<8x128xf32> to vector<1x128xf32>
    %71 = vector.broadcast %70 : vector<1x128xf32> to vector<8x128xf32>
    %72 = arith.addf %69, %71 : vector<8x128xf32>
    %cst_23 = arith.constant dense<0.000000e+00> : vector<128xf32>
    %73 = vector.multi_reduction <add>, %72, %cst_23 [0] : vector<8x128xf32> to vector<128xf32>
    %74 = vector.shape_cast %73 : vector<128xf32> to vector<1x128xf32>
    %cst_24 = arith.constant 8.000000e+00 : f32
    %75 = vector.broadcast %cst_24 : f32 to vector<1x128xf32>
    %76 = arith.divf %74, %75 : vector<1x128xf32>
    %77 = vector.broadcast %76 : vector<1x128xf32> to vector<8x128xf32>
    %78 = arith.subf %72, %77 : vector<8x128xf32>
    %79 = arith.mulf %78, %78 : vector<8x128xf32>
    %cst_25 = arith.constant dense<0.000000e+00> : vector<128xf32>
    %80 = vector.multi_reduction <add>, %79, %cst_25 [0] : vector<8x128xf32> to vector<128xf32>
    %81 = vector.shape_cast %80 : vector<128xf32> to vector<1x128xf32>
    %cst_26 = arith.constant 8.000000e+00 : f32
    %82 = vector.broadcast %cst_26 : f32 to vector<1x128xf32>
    %83 = arith.divf %81, %82 : vector<1x128xf32>
    %cst_27 = arith.constant 9.99999974E-6 : f32
    %84 = vector.broadcast %cst_27 : f32 to vector<1x128xf32>
    %85 = arith.addf %83, %84 : vector<1x128xf32>
    %86 = math.rsqrt %85 : vector<1x128xf32>
    %87 = vector.broadcast %86 : vector<1x128xf32> to vector<8x128xf32>
    %88 = arith.mulf %78, %87 : vector<8x128xf32>
    %89 = vector.extract_strided_slice %5 {offsets = [6, 0], sizes = [1, 128], strides = [1, 1]} : vector<8x128xf32> to vector<1x128xf32>
    %90 = vector.broadcast %89 : vector<1x128xf32> to vector<8x128xf32>
    %91 = arith.mulf %88, %90 : vector<8x128xf32>
    %92 = vector.extract_strided_slice %5 {offsets = [7, 0], sizes = [1, 128], strides = [1, 1]} : vector<8x128xf32> to vector<1x128xf32>
    %93 = vector.broadcast %92 : vector<1x128xf32> to vector<8x128xf32>
    %94 = arith.addf %91, %93 : vector<8x128xf32>
    %95 = arith.addf %94, %34 : vector<8x128xf32>
    %cst_28 = arith.constant 0.000000e+00 : f32
    %96 = vector.broadcast %cst_28 : f32 to vector<8x128xf32>
    %97 = arith.maximumf %95, %96 : vector<8x128xf32>
    %c0_29 = arith.constant 0 : index
    %c0_30 = arith.constant 0 : index
    %98 = vector.load %arg8[%c0_29, %c0_30] : memref<8x128xf32, #tpu.memory_space<vmem>>, vector<8x128xf32>
    tpu.vector_store %arg8[%c0_29, %c0_30], %97 {strides = array<i32>} : memref<8x128xf32, #tpu.memory_space<vmem>>, vector<8x128xf32>,
    %c1_i32 = arith.constant 1 : i32
    %99 = arith.cmpi eq, %arg0, %c1_i32 : i32
    %100 = arith.extui %99 : i1 to i32
    %c0_i32_31 = arith.constant 0 : i32
    %101 = arith.cmpi ne, %100, %c0_i32_31 : i32
    scf.if %101 {
      %c1_i32_32 = arith.constant 1 : i32
      %102 = tpu.memref_slice %arg11[%c1_i32_32] : memref<3x!tpu.dma_semaphore, #tpu.memory_space<semaphore_mem>> -> memref<1x!tpu.dma_semaphore, #tpu.memory_space<semaphore_mem>>
      %103 = tpu.memref_squeeze %102 : memref<1x!tpu.dma_semaphore, #tpu.memory_space<semaphore_mem>> -> memref<!tpu.dma_semaphore, #tpu.memory_space<semaphore_mem>>
      tpu.wait_dma2 semaphore(%103 : memref<!tpu.dma_semaphore, #tpu.memory_space<semaphore_mem>>) src(%arg5 : memref<128x128xbf16, #tpu.memory_space<any>>) dst(%arg9 : memref<128x128xbf16, #tpu.memory_space<vmem>>)
      %c2_i32 = arith.constant 2 : i32
      %104 = tpu.memref_slice %arg11[%c2_i32] : memref<3x!tpu.dma_semaphore, #tpu.memory_space<semaphore_mem>> -> memref<1x!tpu.dma_semaphore, #tpu.memory_space<semaphore_mem>>
      %105 = tpu.memref_squeeze %104 : memref<1x!tpu.dma_semaphore, #tpu.memory_space<semaphore_mem>> -> memref<!tpu.dma_semaphore, #tpu.memory_space<semaphore_mem>>
      tpu.wait_dma2 semaphore(%105 : memref<!tpu.dma_semaphore, #tpu.memory_space<semaphore_mem>>) src(%arg6 : memref<1x128xf32, #tpu.memory_space<any>>) dst(%arg10 : memref<1x128xf32, #tpu.memory_space<vmem>>)
      %106 = arith.truncf %97 : vector<8x128xf32> to vector<8x128xbf16>
      %c0_33 = arith.constant 0 : index
      %c0_34 = arith.constant 0 : index
      %107 = vector.load %arg9[%c0_33, %c0_34] : memref<128x128xbf16, #tpu.memory_space<vmem>>, vector<128x128xbf16>
      %cst_35 = arith.constant dense<0.000000e+00> : vector<8x128xf32>
      %108 = tpu.matmul %106, %107, %cst_35 {dimension_numbers = #tpu.dot_dimension_numbers<[1], [0], [0], [1], [0, 0, 1, 1], [], []>} : vector<8x128xbf16>, vector<128x128xbf16>, vector<8x128xf32> -> vector<8x128xf32>
      %c0_36 = arith.constant 0 : index
      %c0_37 = arith.constant 0 : index
      %109 = vector.load %arg10[%c0_36, %c0_37] : memref<1x128xf32, #tpu.memory_space<vmem>>, vector<1x128xf32>
      %110 = vector.broadcast %109 : vector<1x128xf32> to vector<8x128xf32>
      %111 = arith.addf %108, %110 : vector<8x128xf32>
      %c0_38 = arith.constant 0 : index
      %c0_39 = arith.constant 0 : index
      %112 = vector.load %arg7[%c0_38, %c0_39] : memref<8x128xf32, #tpu.memory_space<vmem>>, vector<8x128xf32>
      tpu.vector_store %arg7[%c0_38, %c0_39], %111 {strides = array<i32>} : memref<8x128xf32, #tpu.memory_space<vmem>>, vector<8x128xf32>,
    } else {
    }
    return
  }
  func.func @transform_1(%arg0: i32) -> (i32, i32, i32) {
    %c0_i32 = arith.constant 0 : i32
    %c0_i32_0 = arith.constant 0 : i32
    %c0_i32_1 = arith.constant 0 : i32
    return %arg0, %c0_i32, %c0_i32_0 : i32, i32, i32
  }
  func.func @transform_2(%arg0: i32) -> (i32, i32, i32) {
    %c0_i32 = arith.constant 0 : i32
    %c0_i32_0 = arith.constant 0 : i32
    %c0_i32_1 = arith.constant 0 : i32
    return %arg0, %c0_i32, %c0_i32_0 : i32, i32, i32
  }
  func.func @transform_3(%arg0: i32) -> (i32, i32, i32) {
    %c0_i32 = arith.constant 0 : i32
    %c0_i32_0 = arith.constant 0 : i32
    %c0_i32_1 = arith.constant 0 : i32
    return %arg0, %c0_i32, %c0_i32_0 : i32, i32, i32
  }
  func.func @transform_6(%arg0: i32) -> (i32, i32) {
    %c0_i32 = arith.constant 0 : i32
    %c0_i32_0 = arith.constant 0 : i32
    %c0_i32_1 = arith.constant 0 : i32
    return %c0_i32, %c0_i32_0 : i32, i32
  }
}

</mosaic_0001>

<bundles_post_ra>
// kernel: tpu_custom_call.1
= control target key start
LH: loop header
LB: loop body
LE: loop exit
PB: predicated region body
PF: predicated region fallthrough
CT: control target
= control target key end

     0   :  { %s1619_s0 = inlined_call_operand.hbm [shape: f32[8,128], index: 0, kind: input, shape index: {}]   ;;  %s1620_s1 = inlined_call_operand.hbm [shape: f32[2,8,128], index: 1, kind: input, shape index: {}]   ;;  %s1621_s2 = inlined_call_operand.hbm [shape: bf16[2,128,128], index: 2, kind: input, shape index: {}]   ;;  %s1622_s3 = inlined_call_operand.hbm [shape: bf16[2,128,128], index: 3, kind: input, shape index: {}]   ;;  %s1623_s4 = inlined_call_operand.hbm [shape: bf16[128,128], index: 4, kind: input, shape index: {}]   ;;  %s1624_s5 = inlined_call_operand.vmem [shape: f32[1,128], index: 5, kind: input, shape index: {}]   ;;  %s1625_s6 = inlined_call_operand.hbm [shape: f32[8,128], index: 6, kind: output, shape index: {}]  }
   0x1   :  { %1631 = sst [smem:[#allocation26_spill]] %s1621_s2 }
   0x2   :  { %11 = vsyncpa [#allocation7], 0 }
   0x3   :  { %13 = vsyncpa [#allocation7 + $0x1], 0 }
   0x4   :  { %14 = vsyncpa [#allocation10], 0 }
   0x5   :  { %16 = vsyncpa [#allocation10 + $0x1], 0 }
   0x6   :  { %17 = vsyncpa [#allocation8], 0  ;;  %s1314_s21 = smov 0   ;;  %s1316_s22 = smov 0  }
   0x7   :  { %s1318_s23 = smov 0   ;;  %s1320_s24 = smov 0  }
   0x8 LB: > { %s1333_s25 = sadd.s32 4294967295, %s1265_s24   ;;  %s1336_s26 = sadd.s32 1, %s1265_s24   ;;  %s1265_s24 = sphi %s1320_s24, %s1645_s24   ;;  %s1261_s23 = sphi %s1318_s23, %s1644_s23   ;;  %s1257_s22 = sphi %s1316_s22, %s1643_s22   ;;  %s1253_s21 = sphi %s1314_s21, %s1642_s21  }
   0x9   : > { %s27_s27 = ssub.s32 %s1265_s24, %s1336_s26  ;;  %s30_s28 = sadd.s32 1, %s1261_s23 }
   0xa   : > { %p28_p0 = scmp.eq.s32.totalorder %s27_s27, 0  ;;  %p37_p1 = scmp.ne.s32.totalorder %s1261_s23, %s1257_s22 }
   0xb   : > { %p38_p2 = scmp.eq.s32.totalorder %s1265_s24, 0  ;;  %p43_p3 = scmp.ne.s32.totalorder %s1257_s22, %s1253_s21 }
   0xc   : > { %s1346_s29 = scalar_select %p28_p0, %s1261_s23, %s30_s28  }
   0xd   : > { %p39_p4 = por %p38_p2, %p37_p1  ;;  %p44_p5 = scmp.eq.s32.totalorder %s1333_s25, 0 }
   0xe   : > { %p991_p6 = scmp.lt.s32.totalorder %s1265_s24, 2  ;;  %s1355_s7 = sand.u32 1, %s1261_s23  }
   0xf   : > { %p1350_p7 = por %p44_p5, %p43_p3  ;;  %s158_s9 = sand.u32 1, %s1265_s24  }
  0x10   : > { %p1357_p8 = pnand %p991_p6, %p39_p4  ;;  %s845_s10 = sshll.u32 %s1355_s7, 6 }
  0x11   : > { %s1632_s30 = scalar_select %p1350_p7, 1, 0 }
  0x12   : > { %s1633_s8 = scalar_select %p1357_p8, 1, 0 }
  0x13   : > { %s882_s11 = sshll.u32 %s1265_s24, 10  ;;  %s162_s12 = scalar_lea.vmem [#allocation9], %s845_s10 }
  0x14   : > { %s169_s13 = sshll.u32 %s162_s12, 4  ;;  %s1634_s2 = sld [smem:[#allocation26_spill]]  ;;  %s1373_s13 = int_to_ptr.vmem [resolvable:$true] %s169_s13 }
  0x15   : > { %s1375_s17 = scalar_lea.sflag [#allocation10], %s158_s9  ;;  %p1381_p10 = pneg %p1357_p8 }
  0x1a   : > { %s1371_s16 = scalar_lea.hbm %s1634_s2, %s882_s11  ;;  %s1062_s27 = scalar_lea.hbm %s1634_s2, 2048 }
  0x1b   : > { %s1057_s18 = scalar_lea.hbm %s1371_s16, 1024  ;;  %p1063_p13 = scmp.lt.u32.totalorder %s1371_s16, %s1634_s2 }
  0x1c   : > { %p1058_p9 = scmp.ne.s32.totalorder %s1371_s16, %s1057_s18  ;;  %p1064_p0 = scmp.lt.u32.totalorder %s1062_s27, %s1057_s18 }
  0x1d   : > { %p1066_p2 = scmp.lt.u32.totalorder %s1057_s18, %s1371_s16 }
  0x1e   : > { %p1060_p11 = pnand %p1381_p10, %p1058_p9  ;;  %p1065_p1 = por %p1064_p0, %p1063_p13 }
  0x20   : > { %p1061_p12 = pneg %p1060_p11  ;;  %p1067_p3 = por %p1066_p2, %p1065_p1 }
  0x22   : > { %p1068_p4 = pnand %p1067_p3, %p1061_p12 }
  0x24   : > { %1071 = shalt.err (!%p1068_p4)
}
  0x25   : > { %s1072_s9 = scalar_lea.vmem %s1373_s13, 1024  ;;  %s1267_s14 = smov [#allocation9]  }
  0x26   : > { %p1073_p5 = scmp.ne.s32.totalorder %s1373_s13, %s1072_s9  ;;  %s1077_s15 = sshll.u32 %s1267_s14, 4  ;;  %s1078_s15 = int_to_ptr.vmem [resolvable:$false] %s1077_s15 }
  0x27   : > { %s1079_s20 = scalar_lea.vmem %s1078_s15, 2048  ;;  %p1080_p11 = scmp.lt.s32.totalorder %s1373_s13, %s1078_s15 }
  0x28   : > { %p1075_p6 = pnand %p1073_p5, %p1381_p10  ;;  %p1081_p7 = scmp.lt.s32.totalorder %s1079_s20, %s1072_s9 }
  0x2a   : > { %p1076_p9 = pneg %p1075_p6  ;;  %p1082_p13 = por %p1081_p7, %p1080_p11 }
  0x2c   : > { %p1083_p0 = pnand %p1082_p13, %p1076_p9 }
  0x2e   : > { %1086 = shalt.err (!%p1083_p0)
}
  0x2f   : > { %s1627_s18 = smov 64   ;;  %s1628_s21 = smov 4  }
  0x30   : > { %987 = dma.hbm_to_vmem [thread:$0]  (!%p1357_p8), %s1371_s16, 1024, %s1373_s13, %s1375_s17, %s1627_s18, %s1627_s18, %s1628_s21  }
  0x31   : > { %s1413_s12 = scalar_lea.hbm %s1622_s3, %s882_s11  ;;  %s183_s9 = scalar_lea.vmem [#allocation11], %s845_s10 }
  0x32   : > { %s190_s14 = sshll.u32 %s183_s9, 4  ;;  %p851_p7 = scmp.ge.s32.totalorder %s1265_s24, 1  ;;  %s1418_s14 = int_to_ptr.vmem [resolvable:$true] %s190_s14 }
  0x33   : > { %p198_p12 = scmp.lt.s32.totalorder %s1265_s24, 3  ;;  %s843_s15 = sshll.u32 %s1355_s7, 3 }
  0x34   : > { %s844_s13 = sshll.u32 %s1265_s24, 7  ;;  %s144_s16 = scalar_lea.vmem [#allocation6], %s843_s15 }
  0x35   : > { %p1422_p1 = pnand %p851_p7, %p198_p12  ;;  %s151_s18 = sshll.u32 %s144_s16, 4  ;;  %s152_s18 = int_to_ptr.vmem [resolvable:$true] %s151_s18 }
  0x36   : > { %s1430_s11 = scalar_lea.hbm %s1620_s1, %s844_s13  ;;  %s141_s10 = scalar_lea.sflag [#allocation7], %s1355_s7 }
  0x37   : > { %s1636_s20 = scalar_select %p1422_p1, 1, 0 }
  0x38   : > { %s1087_s28 = scalar_lea.hbm %s1430_s11, 128  ;;  %s1092_s15 = scalar_lea.hbm %s1620_s1, 256 }
  0x39   : > { %p1088_p2 = scmp.ne.s32.totalorder %s1430_s11, %s1087_s28  ;;  %p1093_p5 = scmp.lt.u32.totalorder %s1430_s11, %s1620_s1 }
  0x3a   : > { %p1094_p6 = scmp.lt.u32.totalorder %s1092_s15, %s1087_s28  ;;  %p1096_p11 = scmp.lt.u32.totalorder %s1087_s28, %s1430_s11 }
  0x3b   : > { %p1090_p3 = pnand %p1088_p2, %p1381_p10 }
  0x3c   : > { %p1095_p9 = por %p1094_p6, %p1093_p5 }
  0x3d   : > { %p1091_p4 = pneg %p1090_p3 }
  0x3e   : > { %p1097_p13 = por %p1096_p11, %p1095_p9 }
  0x40   : > { %p1098_p0 = pnand %p1097_p13, %p1091_p4 }
  0x42   : > { %1101 = shalt.err (!%p1098_p0)
}
  0x43   : > { %s1102_s7 = scalar_lea.vmem %s152_s18, 128  ;;  %s1270_s21 = smov [#allocation6]  }
  0x44   : > { %p1103_p7 = scmp.ne.s32.totalorder %s152_s18, %s1102_s7  ;;  %s1107_s13 = sshll.u32 %s1270_s21, 4  ;;  %s1108_s13 = int_to_ptr.vmem [resolvable:$false] %s1107_s13 }
  0x45   : > { %s1109_s27 = scalar_lea.vmem %s1108_s13, 256  ;;  %p1110_p3 = scmp.lt.s32.totalorder %s152_s18, %s1108_s13 }
  0x46   : > { %p1105_p12 = pnand %p1103_p7, %p1381_p10  ;;  %p1111_p1 = scmp.lt.s32.totalorder %s1109_s27, %s1102_s7 }
  0x48   : > { %p1106_p2 = pneg %p1105_p12  ;;  %p1112_p8 = por %p1111_p1, %p1110_p3 }
  0x4a   : > { %p1113_p5 = pnand %p1112_p8, %p1106_p2 }
  0x4c   : > { %1116 = shalt.err (!%p1113_p5)
}
  0x4d   : > { %p1637_p6 = scmp.ne.s32.totalorder %s1633_s8, 0  ;;  %s1117_s2 = scalar_lea.hbm %s1413_s12, 1024 }
  0x4e   : > { %p1118_p4 = scmp.ne.s32.totalorder %s1413_s12, %s1117_s2  ;;  %s1122_s24 = scalar_lea.hbm %s1622_s3, 2048 }
  0x4f   : > { %984 = dma.hbm_to_vmem [thread:$0]  (!%p1637_p6), %s1430_s11, 128, %s152_s18, %s141_s10  }
  0x50   : > { %p1120_p9 = pnand %p1118_p4, %p1381_p10  ;;  %p1123_p8 = scmp.lt.u32.totalorder %s1413_s12, %s1622_s3 }
  0x51   : > { %p1124_p1 = scmp.lt.u32.totalorder %s1122_s24, %s1117_s2  ;;  %p1126_p0 = scmp.lt.u32.totalorder %s1117_s2, %s1413_s12 }
  0x52   : > { %p1121_p11 = pneg %p1120_p9 }
  0x53   : > { %p1125_p13 = por %p1124_p1, %p1123_p8 }
  0x55   : > { %p1127_p7 = por %p1126_p0, %p1125_p13 }
  0x57   : > { %p1128_p12 = pnand %p1127_p7, %p1121_p11 }
  0x59   : > { %1131 = shalt.err (!%p1128_p12)
}
  0x5a   : > { %s1132_s18 = scalar_lea.vmem %s1418_s14, 1024  ;;  %s1271_s11 = smov [#allocation11]  }
  0x5b   : > { %p1133_p2 = scmp.ne.s32.totalorder %s1418_s14, %s1132_s18  ;;  %s1137_s10 = sshll.u32 %s1271_s11, 4  ;;  %s1138_s10 = int_to_ptr.vmem [resolvable:$false] %s1137_s10 }
  0x5c   : > { %s1139_s7 = scalar_lea.vmem %s1138_s10, 2048  ;;  %p1140_p4 = scmp.lt.s32.totalorder %s1418_s14, %s1138_s10 }
  0x5d   : > { %p1135_p3 = pnand %p1133_p2, %p1381_p10  ;;  %p1141_p9 = scmp.lt.s32.totalorder %s1139_s7, %s1132_s18 }
  0x5f   : > { %p1136_p5 = pneg %p1135_p3  ;;  %p1142_p8 = por %p1141_p9, %p1140_p4 }
  0x61   : > { %p1143_p1 = pnand %p1142_p8, %p1136_p5 }
  0x63   : > { %1146 = shalt.err (!%p1143_p1)
}
  0x64   : > { %s1638_s21 = smov 4   ;;  %s1639_s13 = smov 64  }
  0x65   : > { %990 = dma.hbm_to_vmem [thread:$0]  (!%p1637_p6), %s1413_s12, 1024, %s1418_s14, %s1375_s17, %s1639_s13, %s1639_s13, %s1638_s21  }
  0x66   : > { %p1640_p10 = scmp.ne.s32.totalorder %s1636_s20, 0 }
  0x67   : > { %s204_s19 = sand.u32 (!%p1640_p10), 1, %s1257_s22   ;;  %p1641_p11 = scmp.ne.s32.totalorder (!%p1640_p10), %s1632_s30, 0 }
  0x68   : > { %202 = sbr.rel (%p1640_p10) target bundleno = 1283 (0x503), region = 32  ;;  %s852_s27 = sshll.u32 (!%p1640_p10), %s204_s19, 3 }
  0x69   : > { %s205_s2 = scalar_lea.sflag (!%p1640_p10), [#allocation7], %s204_s19  ;;  %s1478_s28 = scalar_lea.vmem (!%p1640_p10), [#allocation6], %s852_s27 }
  0x6f   : > { %1234 = dma.done.wait (%p1641_p11), %s205_s2, 128  }
  0x70   : > { %1236 = vsyncadd (%p1641_p11), %s205_s2, 4294967168  ;;  %s213_s8 = sand.u32 1, %s1333_s25   ;;  %s853_s9 = sshll.u32 %s204_s19, 6 }
  0x71   : > { %s214_s17 = scalar_lea.sflag [#allocation10], %s213_s8  ;;  %s1485_s12 = scalar_lea.vmem [#allocation9], %s853_s9 }
  0x72   : > { %1238 = dma.done.wait (%p1641_p11), %s214_s17, 2048  }
  0x73   : > { %1240 = vsyncadd (%p1641_p11), %s214_s17, 4294965248  ;;  %s1491_s14 = scalar_lea.vmem [#allocation11], %s853_s9  ;;  %p855_p6 = scmp.ne.s32.totalorder %s1333_s25, 0 }
  0x74   : > { %v300_v0 = vld [vmem:[%s1624_s5] sm:$0x1] (!%p855_p6)  ;;  %s1272_s15 = smov (!%p855_p6), [#allocation2]   ;;  %s1273_s18 = smov (!%p855_p6), [#allocation3]  }
  0x75   : > { %258 = sbr.rel (%p855_p6) target bundleno = 152 (0x98), region = 48  ;;  %s266_s16 = sshll.u32 (!%p855_p6), %s1272_s15, 4  ;;  %301 = vst [vmem:[#allocation4] sm:$0x1] (!%p855_p6), %v300_v0  ;;  %s267_s16 = int_to_ptr.vmem [resolvable:$true] %s266_s16 }
  0x76   : > { %s278_s11 = sshll.u32 (!%p855_p6), %s1273_s18, 4  ;;  %s1147_s30 = scalar_lea.hbm (!%p855_p6), %s1619_s0, 128  ;;  %s279_s11 = int_to_ptr.vmem [resolvable:$true] %s278_s11 }
  0x77   : > { %p1148_p13 = scmp.ne.s32.totalorder (!%p855_p6), %s1619_s0, %s1147_s30  ;;  %p1151_p0 = scmp.lt.u32.totalorder (!%p855_p6), %s1147_s30, %s1619_s0 }
  0x79   : > { %p1153_p7 = pnand (!%p855_p6), %p1151_p0, %p1148_p13 }
  0x7c   : > { %1156 = shalt.err (!%p1153_p7)  }
  0x7d   : > { %s1157_s2 = scalar_lea.vmem %s267_s16, 128  ;;  %p1162_p2 = scmp.lt.s32.totalorder %s267_s16, %s267_s16 }
  0x7e   : > { %p1158_p12 = scmp.ne.s32.totalorder %s267_s16, %s1157_s2  ;;  %p1163_p3 = scmp.lt.s32.totalorder %s1157_s2, %s1157_s2 }
  0x80   : > { %p1164_p5 = por %p1163_p3, %p1162_p2 }
  0x82   : > { %p1165_p4 = pnand %p1164_p5, %p1158_p12 }
  0x84   : > { %1168 = shalt.err (!%p1165_p4)  }
  0x85   : > { %269 = dma.hbm_to_vmem [thread:$0]  %s1619_s0, 128, %s267_s16, [#allocation5] }
  0x86   : > { %s1169_s24 = scalar_lea.hbm %s1623_s4, 1024 }
  0x87   : > { %p1170_p9 = scmp.ne.s32.totalorder %s1623_s4, %s1169_s24  ;;  %p1173_p8 = scmp.lt.u32.totalorder %s1169_s24, %s1623_s4 }
  0x89   : > { %p1175_p1 = pnand %p1173_p8, %p1170_p9 }
  0x8b   : > { %1178 = shalt.err (!%p1175_p1)  }
  0x8c   : > { %s1179_s30 = scalar_lea.vmem %s279_s11, 1024  ;;  %p1184_p11 = scmp.lt.s32.totalorder %s279_s11, %s279_s11 }
  0x8d   : > { %p1180_p10 = scmp.ne.s32.totalorder %s279_s11, %s1179_s30  ;;  %p1185_p6 = scmp.lt.s32.totalorder %s1179_s30, %s1179_s30 }
  0x8f   : > { %p1186_p13 = por %p1185_p6, %p1184_p11 }
  0x91   : > { %p1187_p0 = pnand %p1186_p13, %p1180_p10 }
  0x93   : > { %1190 = shalt.err (!%p1187_p0)  }
  0x94   : > { %281 = dma.hbm_to_vmem [thread:$0]  %s1623_s4, 1024, %s279_s11, [#allocation5 + $0x1] }
  0x95   : > { %326 = vsyncadd [#allocation5 + $0x2], 16 }
  0x96   : > { %1241 = dma.done.wait [#allocation5], 128 }
  0x97   : > { %1242 = vsyncadd [#allocation5], 4294967168 }
  0x98 PF: > { %v330_v1 = vld [vmem:[#allocation2] sm:$0xff]  ;;  %v1274_v2 = vmov 0.0   ;;  %v332_v5 = vlaneseq  ;;  %v1037_v13 = vld [vmem:[%s1485_s12 + $0x10] sm:$0xff]   ;;  %v1038_v14 = vld [vmem:[%s1485_s12 + $0x18] sm:$0xff]   ;;  %vm1275_vm1 = vmmov 0   ;;  %p873_p7 = scmp.ne.s32.totalorder %s1333_s25, 1 }
  0x99   : > { %337 = vadd.xlane.f32.xlu0 %v330_v1  ;;  %911 = vmatprep.subr.bf16.mxu0 %v1274_v2  ;;  %v1035_v3 = vld [vmem:[%s1485_s12] sm:$0xff]   ;;  %v1036_v4 = vld [vmem:[%s1485_s12 + $0x8] sm:$0xff]   ;;  %v1041_v17 = vld [vmem:[%s1485_s12 + $0x30] sm:$0xff]  }
  0x9a   : > { %931 = vmatprep.subr.bf16.mxu1 %v1274_v2  ;;  %912 = vmatpush3.bf16.msra.mxu0 %v1035_v3  ;;  %v333_v6 = vand.u32 127, %v332_v5  ;;  %v1039_v15 = vld [vmem:[%s1485_s12 + $0x20] sm:$0xff]   ;;  %v1040_v16 = vld [vmem:[%s1485_s12 + $0x28] sm:$0xff]   ;;  %v1042_v18 = vld [vmem:[%s1485_s12 + $0x38] sm:$0xff]   ;;  %v1541_v22 = vshrl.u32 %v332_v5, 7 }
  0x9b   : > { %913 = vmatprep.subr.bf16.mxu0 %v1274_v2  ;;  %927 = vmatprep.mubr.msk.bf16.mxu0 %vm1275_vm1, %v1274_v2  ;;  %v1545_v24 = vld [vmem:[%s1478_s28] sm:$0xff]  ;;  %v1043_v33 = vld [vmem:[%s1491_s14] sm:$0xff]   ;;  %v1044_v34 = vld [vmem:[%s1491_s14 + $0x8] sm:$0xff]  }
  0x9c   : > { %vm334_vm0 = vcmp.lt.s32.totalorder %v333_v6, 32  ;;  %947 = vmatprep.mubr.msk.bf16.mxu1 %vm1275_vm1, %v1274_v2  ;;  %v351_v23 = vsub.s32 0, %v1541_v22  ;;  %v356_v25 = vsub.s32 1, %v1541_v22  ;;  %932 = vmatpush3.bf16.msra.mxu1 %v1043_v33  ;;  %v1045_v35 = vld [vmem:[%s1491_s14 + $0x10] sm:$0xff]   ;;  %v1046_v36 = vld [vmem:[%s1491_s14 + $0x18] sm:$0xff]   ;;  %v1047_v37 = vld [vmem:[%s1491_s14 + $0x20] sm:$0xff]  }
  0x9d   : > { %v856_v9 = vsel %vm334_vm0, 1.0, %v1274_v2  ;;  %933 = vmatprep.subr.bf16.mxu1 %v1274_v2  ;;  %v1048_v38 = vld [vmem:[%s1491_s14 + $0x28] sm:$0xff]   ;;  %v1049_v39 = vld [vmem:[%s1491_s14 + $0x30] sm:$0xff]   ;;  %v1050_v40 = vld [vmem:[%s1491_s14 + $0x38] sm:$0xff]   ;;  %v378_v41 = vsub.s32 2, %v1541_v22 }
  0x9e   : > { %914 = vmatpush3.bf16.msra.mxu0 %v1036_v4  ;;  %v352_v26 = vrot.slane %v1545_v24, %v351_v23  ;;  %v357_v29 = vrot.slane %v1545_v24, %v356_v25 }
  0x9f   : > { %915 = vmatprep.subr.bf16.mxu0 %v1274_v2  ;;  %v379_v42 = vrot.slane %v1545_v24, %v378_v41 }
  0xa0   : > { %934 = vmatpush3.bf16.msra.mxu1 %v1044_v34 }
  0xa1   : > { %935 = vmatprep.subr.bf16.mxu1 %v1274_v2 }
  0xa2   : > { %916 = vmatpush3.bf16.msra.mxu0 %v1037_v13 }
  0xa3   : > { %917 = vmatprep.subr.bf16.mxu0 %v1274_v2 }
  0xa4   : > { %936 = vmatpush3.bf16.msra.mxu1 %v1045_v35 }
  0xa5   : > { %937 = vmatprep.subr.bf16.mxu1 %v1274_v2 }
  0xa6   : > { %918 = vmatpush3.bf16.msra.mxu0 %v1038_v14 }
  0xa7   : > { %919 = vmatprep.subr.bf16.mxu0 %v1274_v2 }
  0xa8   : > { %938 = vmatpush3.bf16.msra.mxu1 %v1046_v36 }
  0xa9   : > { %939 = vmatprep.subr.bf16.mxu1 %v1274_v2 }
  0xaa   : > { %920 = vmatpush3.bf16.msra.mxu0 %v1039_v15 }
  0xab   : > { %921 = vmatprep.subr.bf16.mxu0 %v1274_v2 }
  0xac   : > { %940 = vmatpush3.bf16.msra.mxu1 %v1047_v37 }
  0xad   : > { %941 = vmatprep.subr.bf16.mxu1 %v1274_v2 }
  0xae   : > { %922 = vmatpush3.bf16.msra.mxu0 %v1040_v16 }
  0xaf   : > { %923 = vmatprep.subr.bf16.mxu0 %v1274_v2 }
  0xb0   : > { %942 = vmatpush3.bf16.msra.mxu1 %v1048_v38  ;;  %v629_v38 = vsub.s32 6, %v1541_v22 }
  0xb1   : > { %943 = vmatprep.subr.bf16.mxu1 %v1274_v2 }
  0xb2   : > { %924 = vmatpush3.bf16.msra.mxu0 %v1041_v17 }
  0xb3   : > { %925 = vmatprep.subr.bf16.mxu0 %v1274_v2 }
  0xb4   : > { %944 = vmatpush3.bf16.msra.mxu1 %v1049_v39  ;;  %v634_v39 = vsub.s32 7, %v1541_v22 }
  0xb5   : > { %945 = vmatprep.subr.bf16.mxu1 %v1274_v2  ;;  %v495_v2 = vsub.s32 4, %v1541_v22 }
  0xb6   : > { %926 = vmatpush3.bf16.msra.mxu0 %v1042_v18 }
  0xb7   : > { %v496_v6 = vrot.slane %v1545_v24, %v495_v2 }
  0xb8   : > { %946 = vmatpush3.bf16.msra.mxu1 %v1050_v40  ;;  %v630_v40 = vrot.slane %v1545_v24, %v629_v38 }
 0x126   : > { %v338_v7 = vpop.xlane.xlu0 %337 }
 0x127   : > { %v339_v8 = vmul.f32 0.03125, %v338_v7 }
 0x129   : > { %v340_v10 = vsub.f32 %v330_v1, %v339_v8  ;;  %v490_v1 = vsub.s32 3, %v1541_v22 }
 0x12b   : > { %v341_v11 = vmul.f32 %v856_v9, %v340_v10  ;;  %v491_v3 = vrot.slane %v1545_v24, %v490_v1 }
 0x12d   : > { %v342_v12 = vmul.f32 %v341_v11, %v341_v11 }
 0x12f   : > { %343 = vadd.xlane.f32.xlu0 %v342_v12 }
 0x1bc   : > { %v344_v19 = vpop.xlane.xlu0 %343 }
 0x1bd   : > { %v345_v20 = vmul.f32 0.03125, %v344_v19 }
 0x1bf   : > { %v346_v21 = vadd.f32 1e-05, %v345_v20 }
 0x1c1   : > { %1051 = vrsqrt.f32 %v346_v21 }
 0x1cb   : > { %v1052_v27 = vpop.eup %1051 }
 0x1cc   : > { %v348_v28 = vmul.f32 %v1052_v27, %v341_v11  ;;  %v518_v11 = vsub.s32 5, %v1541_v22 }
 0x1ce   : > { %v353_v30 = vmul.f32 %v352_v26, %v348_v28  ;;  %v519_v12 = vrot.slane %v1545_v24, %v518_v11 }
 0x1d0   : > { %v1550_v31 = vadd.f32 %v357_v29, %v353_v30 }
 0x1d2   : > { %v359_v32 = vpack.c.bf16 %v1550_v31, %v1550_v31 }
 0x1d4   : > { %928 = vmatmul.mubr.bf16.vlgmr.msra.gmra.mrb[0].mxu0 %v359_v32 }
 0x2a7   : > { %v462_v43 = vpop.f32.mrb[0].mxu0 }
 0x2a8   : > { %v463_v44 = vadd.f32 %v462_v43, %v379_v42  ;;  %v929_v45 = vpop.f32.mrb[1].mxu0  ;;  %v635_v43 = vrot.slane %v1545_v24, %v634_v39 }
 0x2a9   : > { %v465_v46 = vpop.f32.mrb[2].mxu0 }
 0x2aa   : > { %v468_v47 = vrot.slane %v463_v44, 4  ;;  %v930_v48 = vpop.f32.mrb[3].mxu0 }
 0x2ac   : > { %v469_v49 = vadd.f32 %v468_v47, %v463_v44 }
 0x2ae   : > { %v470_v50 = vrot.slane %v469_v49, 2 }
 0x2b0   : > { %v471_v51 = vadd.f32 %v470_v50, %v469_v49 }
 0x2b2   : > { %v472_v52 = vrot.slane %v471_v51, 1 }
 0x2b4   : > { %v473_v53 = vadd.f32 %v472_v52, %v471_v51 }
 0x2b6   : > { %v475_v54 = vmul.f32 0.125, %v473_v53 }
 0x2b8   : > { %v476_v55 = vsub.f32 %v463_v44, %v475_v54 }
 0x2ba   : > { %v477_v56 = vmul.f32 %v476_v55, %v476_v55 }
 0x2bc   : > { %v478_v57 = vrot.slane %v477_v56, 4 }
 0x2be   : > { %v479_v58 = vadd.f32 %v478_v57, %v477_v56 }
 0x2c0   : > { %v480_v59 = vrot.slane %v479_v58, 2 }
 0x2c2   : > { %v481_v60 = vadd.f32 %v480_v59, %v479_v58 }
 0x2c4   : > { %v482_v61 = vrot.slane %v481_v60, 1 }
 0x2c6   : > { %v483_v62 = vadd.f32 %v482_v61, %v481_v60 }
 0x2c8   : > { %v484_v63 = vmul.f32 0.125, %v483_v62 }
 0x2ca   : > { %v485_v0 = vadd.f32 1e-05, %v484_v63 }
 0x2cc   : > { %1053 = vrsqrt.f32 %v485_v0 }
 0x2d6   : > { %v1054_v4 = vpop.eup %1053 }
 0x2d7   : > { %v487_v5 = vmul.f32 %v1054_v4, %v476_v55 }
 0x2d9   : > { %v492_v7 = vmul.f32 %v491_v3, %v487_v5 }
 0x2db   : > { %v497_v8 = vadd.f32 %v496_v6, %v492_v7 }
 0x2dd   : > { %v498_v9 = vmax.f32 %v497_v8, 0.0 }
 0x2df   : > { %v499_v10 = vpack.c.bf16 %v498_v9, %v498_v9 }
 0x2e1   : > { %948 = vmatmul.mubr.bf16.vlgmr.msra.gmra.mrb[0].mxu1 %v499_v10 }
 0x3b4   : > { %v602_v13 = vpop.f32.mrb[0].mxu1 }
 0x3b5   : > { %v603_v14 = vadd.f32 %v602_v13, %v519_v12  ;;  %v949_v15 = vpop.f32.mrb[1].mxu1 }
 0x3b6   : > { %v605_v16 = vpop.f32.mrb[2].mxu1 }
 0x3b7   : > { %v608_v17 = vrot.slane %v603_v14, 4  ;;  %v950_v18 = vpop.f32.mrb[3].mxu1 }
 0x3b9   : > { %v609_v19 = vadd.f32 %v608_v17, %v603_v14 }
 0x3bb   : > { %v610_v20 = vrot.slane %v609_v19, 2 }
 0x3bd   : > { %v611_v21 = vadd.f32 %v610_v20, %v609_v19 }
 0x3bf   : > { %v612_v23 = vrot.slane %v611_v21, 1 }
 0x3c1   : > { %v613_v25 = vadd.f32 %v612_v23, %v611_v21 }
 0x3c3   : > { %v614_v26 = vmul.f32 0.125, %v613_v25 }
 0x3c5   : > { %v615_v27 = vsub.f32 %v603_v14, %v614_v26 }
 0x3c7   : > { %v616_v28 = vmul.f32 %v615_v27, %v615_v27 }
 0x3c9   : > { %v617_v29 = vrot.slane %v616_v28, 4 }
 0x3cb   : > { %v618_v30 = vadd.f32 %v617_v29, %v616_v28 }
 0x3cd   : > { %v619_v32 = vrot.slane %v618_v30, 2 }
 0x3cf   : > { %v620_v33 = vadd.f32 %v619_v32, %v618_v30 }
 0x3d1   : > { %v621_v34 = vrot.slane %v620_v33, 1 }
 0x3d3   : > { %v622_v35 = vadd.f32 %v621_v34, %v620_v33 }
 0x3d5   : > { %v623_v36 = vmul.f32 0.125, %v622_v35 }
 0x3d7   : > { %v624_v37 = vadd.f32 1e-05, %v623_v36 }
 0x3d9   : > { %1055 = vrsqrt.f32 %v624_v37 }
 0x3e3   : > { %v1056_v41 = vpop.eup %1055 }
 0x3e4   : > { %v626_v42 = vmul.f32 %v1056_v41, %v615_v27 }
 0x3e6   : > { %v631_v44 = vmul.f32 %v630_v40, %v626_v42 }
 0x3e8   : > { %v636_v45 = vadd.f32 %v635_v43, %v631_v44  ;;  %643 = sbr.rel (%p873_p7) target bundleno = 1258 (0x4ea), region = 90 }
 0x3ea   : > { %v637_v46 = vadd.f32 %v636_v45, %v1550_v31 }
 0x3ec   : > { %v638_v47 = vmax.f32 %v637_v46, 0.0 }
 0x3ee   : > { %639 = vst [vmem:[#allocation2] sm:$0xff] %v638_v47 }
 0x3ef   : > { %1243 = dma.done.wait [#allocation5 + $0x1], 1024 }
 0x3f0   : > { %1244 = vsyncadd [#allocation5 + $0x1], 4294966272 }
 0x3f1   : > { %1245 = dma.done.wait [#allocation5 + $0x2], 16 }
 0x3f2   : > { %1246 = vsyncadd [#allocation5 + $0x2], 4294967280  ;;  %v1276_v22 = vmov 0.0   ;;  %vm1277_vm2 = vmmov 0   ;;  %v654_v48 = vld [vmem:[#allocation3] sm:$0xff]  ;;  %v655_v24 = vld [vmem:[#allocation3 + $0x8] sm:$0xff]  ;;  %v653_v54 = vpack.c.bf16 %v638_v47, %v638_v47 }
 0x3f3   : > { %951 = vmatprep.subr.bf16.mxu0 %v1276_v22  ;;  %967 = vmatprep.mubr.msk.bf16.mxu0 %vm1277_vm2, %v1276_v22  ;;  %v656_v31 = vld [vmem:[#allocation3 + $0x10] sm:$0xff]  ;;  %v657_v49 = vld [vmem:[#allocation3 + $0x18] sm:$0xff]  ;;  %v658_v50 = vld [vmem:[#allocation3 + $0x20] sm:$0xff] }
 0x3f4   : > { %952 = vmatpush3.bf16.msra.mxu0 %v654_v48  ;;  %v659_v51 = vld [vmem:[#allocation3 + $0x28] sm:$0xff]  ;;  %v660_v52 = vld [vmem:[#allocation3 + $0x30] sm:$0xff]  ;;  %v661_v53 = vld [vmem:[#allocation3 + $0x38] sm:$0xff] }
 0x3f5   : > { %953 = vmatprep.subr.bf16.mxu0 %v1276_v22  ;;  %v874_v55 = vld [vmem:[#allocation4] ss:$0 sm:$0xff] }
 0x3f8   : > { %954 = vmatpush3.bf16.msra.mxu0 %v655_v24 }
 0x3f9   : > { %955 = vmatprep.subr.bf16.mxu0 %v1276_v22 }
 0x3fc   : > { %956 = vmatpush3.bf16.msra.mxu0 %v656_v31 }
 0x3fd   : > { %957 = vmatprep.subr.bf16.mxu0 %v1276_v22 }
 0x400   : > { %958 = vmatpush3.bf16.msra.mxu0 %v657_v49 }
 0x401   : > { %959 = vmatprep.subr.bf16.mxu0 %v1276_v22 }
 0x404   : > { %960 = vmatpush3.bf16.msra.mxu0 %v658_v50 }
 0x405   : > { %961 = vmatprep.subr.bf16.mxu0 %v1276_v22 }
 0x408   : > { %962 = vmatpush3.bf16.msra.mxu0 %v659_v51 }
 0x409   : > { %963 = vmatprep.subr.bf16.mxu0 %v1276_v22 }
 0x40c   : > { %964 = vmatpush3.bf16.msra.mxu0 %v660_v52 }
 0x40d   : > { %965 = vmatprep.subr.bf16.mxu0 %v1276_v22 }
 0x410   : > { %966 = vmatpush3.bf16.msra.mxu0 %v661_v53 }
 0x413   : > { %968 = vmatmul.mubr.bf16.vlgmr.msra.gmra.mrb[0].mxu0 %v653_v54 }
 0x4e6   : > { %v703_v56 = vpop.f32.mrb[0].mxu0 }
 0x4e7   : > { %v704_v57 = vadd.f32 %v874_v55, %v703_v56  ;;  %v969_v58 = vpop.f32.mrb[1].mxu0 }
 0x4e8   : > { %v706_v59 = vpop.f32.mrb[2].mxu0 }
 0x4e9   : > { %709 = vst [vmem:[#allocation12] sm:$0xff] %v704_v57  ;;  %v970_v60 = vpop.f32.mrb[3].mxu0 }
 0x4ea PF: > { %p992_p12 = scmp.eq.s32.totalorder %s1333_s25, 1  ;;  %s1278_s28 = smov [#allocation12]  }
 0x4eb   : > { %s717_s12 = sshll.u32 %s1278_s28, 4  ;;  %s718_s12 = int_to_ptr.vmem [resolvable:$true] %s717_s12 }
 0x4ec   : > { %s1191_s14 = scalar_lea.vmem %s718_s12, 128  ;;  %p1198_p4 = scmp.lt.s32.totalorder %s718_s12, %s718_s12 }
 0x4ed   : > { %p1192_p2 = scmp.ne.s32.totalorder %s718_s12, %s1191_s14  ;;  %p1199_p9 = scmp.lt.s32.totalorder %s1191_s14, %s1191_s14 }
 0x4ef   : > { %p1193_p3 = pnand %p1192_p2, %p992_p12  ;;  %p1200_p8 = por %p1199_p9, %p1198_p4 }
 0x4f1   : > { %p1194_p5 = pneg %p1193_p3 }
 0x4f3   : > { %p1201_p1 = pnand %p1200_p8, %p1194_p5 }
 0x4f5   : > { %1204 = shalt.err (!%p1201_p1)
}
 0x4f6   : > { %s1205_s19 = scalar_lea.hbm %s1625_s6, 128 }
 0x4f7   : > { %p1206_p10 = scmp.ne.s32.totalorder %s1625_s6, %s1205_s19  ;;  %p1211_p13 = scmp.lt.u32.totalorder %s1205_s19, %s1625_s6 }
 0x4f9   : > { %p1207_p11 = pnand %p1206_p10, %p992_p12 }
 0x4fb   : > { %p1208_p6 = pneg %p1207_p11 }
 0x4fd   : > { %p1213_p0 = pnand %p1211_p13, %p1208_p6 }
 0x4ff   : > { %1216 = shalt.err (!%p1213_p0)
}
 0x500   : > { %978 = dma.vmem_to_hbm [thread:$0]  (%p992_p12), %s718_s12, 128, %s1625_s6, [#allocation8]  }
 0x501   : > { %1248 = dma.done.wait (%p992_p12), [#allocation8], 128  }
 0x502   : > { %1250 = vsyncadd (%p992_p12), [#allocation8], 4294967168 }
 0x503 PF: > { %p20_p7 = scmp.ge.s32.totalorder %s1336_s26, 4   ;;  %s1642_s21 = smov %s1257_s22 }
 0x504   : > { %s1643_s22 = smov %s1261_s23  ;;  %s1644_s23 = smov %s1346_s29 }
 0x505   : > { %s1645_s24 = smov %s1336_s26  ;;  %22 = sbr.rel (!%p20_p7) target bundleno = 8 (0x8), region = 155 }
 0x50c   :  { %730 = vsyncpa [#allocation7], 1 }
 0x50d   :  { %732 = vsyncpa [#allocation7 + $0x1], 1 }
 0x50e   :  { %733 = vsyncpa [#allocation10], 1 }
 0x50f   :  { %735 = vsyncpa [#allocation10 + $0x1], 1 }
 0x510   :  { %736 = vsyncpa [#allocation8], 1 }
 0x511   :  { %738 = vsyncpa [#allocation8 + $0x1], 1 }
 0x512   :  { %739 = vsyncmov [#allocation5] }
 0x515   :  { %s740_s25 = vpop.sfrf %739 }
 0x516   :  { %p879_p12 = scmp.ne.s32.totalorder %s740_s25, 0 }
 0x518   :  { %744 = shalt.err (%p879_p12)  }
 0x519   :  { %746 = vsyncmov [#allocation5 + $0x1] }
 0x51c   :  { %s747_s24 = vpop.sfrf %746 }
 0x51d   :  { %p880_p2 = scmp.ne.s32.totalorder %s747_s24, 0 }
 0x51f   :  { %751 = shalt.err (%p880_p2)  }
 0x520   :  { %753 = vsyncmov [#allocation5 + $0x2] }
 0x523   :  { %s754_s15 = vpop.sfrf %753 }
 0x524   :  { %p881_p3 = scmp.ne.s32.totalorder %s754_s15, 0 }
 0x526   :  { %758 = shalt.err (%p881_p3)  }

</bundles_post_ra>
